<compile_context>
chip_gen: v7x
topology: tpu7x:2x2x1
jax: 0.10.0
libtpu: 0.0.40
codegen_flags: <defaults>
</compile_context>

<pallas_src>
import jax
import jax.numpy as jnp
from jax.experimental import pallas as pl
from jax.experimental.pallas import tpu as pltpu


LANE = 128
WIDE_COLS = 1024                      # 8 x 128 lanes -> unmasked, lane-dense vst
TARGET_BLOCK_BYTES = 8 * 1024 * 1024  # <= ~8 MiB/block: fits v7x 64 MiB VMEM with
                                      # in/out double-buffering (~32 MiB total)
VMEM_LIMIT_BYTES = 48 * 1024 * 1024   # above 16/32 MiB scoped defaults, below v7x 64 MiB


def _identity_kernel(x_ref, o_ref):
    # Pure pass-through: copy the current VMEM tile to the output tile.
    o_ref[...] = x_ref[...]


def identity(x: jax.Array) -> jax.Array:
    """Pallas implementation of Identity.forward: returns x unchanged."""
    orig_shape = x.shape
    orig_dtype = x.dtype
    n = x.size

    if n == 0:
        # Nothing to copy.
        return x

    itemsize = jnp.dtype(orig_dtype).itemsize
    # Native sublane packing: 8 rows for 32-bit, 16 for 16-bit, 32 for 8-bit.
    sublane_min = max(8, 32 // max(itemsize, 1))

    # Lane-dense 2D slab. Wide (1024-lane) slab for big tensors, 128 lanes for
    # tiny ones. Pad the flat array instead of ever using a non-128 lane width
    # or a single whole-array VMEM block.
    cols = WIDE_COLS if n >= WIDE_COLS else LANE
    rows = pl.cdiv(n, cols)
    padded = rows * cols

    flat = x.reshape(-1)
    if padded != n:
        flat = jnp.pad(flat, (0, padded - n))
    x2 = flat.reshape(rows, cols)

    # Block sizing: ~TARGET_BLOCK_BYTES per block, sublane-aligned. The grid
    # uses cdiv so the ragged last block is handled by masking (no divisor
    # halving that could collapse to tiny tiles).
    tile_rows = max(sublane_min, TARGET_BLOCK_BYTES // (cols * itemsize))
    tile_rows = (tile_rows // sublane_min) * sublane_min
    tile_rows = min(tile_rows, rows)

    # Prefer >= 2 grid steps when the tensor allows it (v7x megacore: both
    # TensorCores issue DMAs and share the HBM bandwidth).
    if rows >= 2 * sublane_min and pl.cdiv(rows, tile_rows) < 2:
        half = pl.cdiv(pl.cdiv(rows, 2), sublane_min) * sublane_min
        tile_rows = min(max(sublane_min, half), rows)

    grid = (pl.cdiv(rows, tile_rows),)

    out2 = pl.pallas_call(
        _identity_kernel,
        out_shape=jax.ShapeDtypeStruct((rows, cols), orig_dtype),
        grid_spec=pltpu.PrefetchScalarGridSpec(
            num_scalar_prefetch=0,
            grid=grid,
            in_specs=[pl.BlockSpec((tile_rows, cols), lambda i: (i, 0))],
            out_specs=pl.BlockSpec((tile_rows, cols), lambda i: (i, 0)),
        ),
        # Alias input 0 -> output 0: under jit the copy's output reuses the
        # input buffer (no extra allocation / round trip around the call).
        input_output_aliases={0: 0},
        compiler_params=pltpu.CompilerParams(
            dimension_semantics=("parallel",),
            vmem_limit_bytes=VMEM_LIMIT_BYTES,
        ),
    )(x2)

    out_flat = out2.reshape(-1)
    if padded != n:
        out_flat = out_flat[:n]
    return out_flat.reshape(orig_shape)


if __name__ == "__main__":
    key = jax.random.PRNGKey(0)

    identity_fn = jax.jit(identity)

    # Small NCHW-shaped input consistent with typical use of Identity.
    x = jax.random.normal(key, (2, 4, 16, 16), dtype=jnp.float32)
    y = identity_fn(x)
    jax.block_until_ready(y)
    assert y.shape == x.shape
    assert y.dtype == x.dtype
    assert bool(jnp.all(y == x))

    # Ragged (non-128-divisible) size + sub-32-bit dtype exercises the pad path.
    x2 = jax.random.normal(key, (3, 5, 7), dtype=jnp.bfloat16)
    y2 = identity_fn(x2)
    jax.block_until_ready(y2)
    assert y2.shape == x2.shape
    assert y2.dtype == x2.dtype
    assert bool(jnp.all(y2 == x2))

    print("KERNEL_OK")
</pallas_src>

<mosaic_0001>
module attributes {stable_mosaic.version = 11 : i64} {
  func.func @_identity_kernel(%arg0: i32, %arg1: memref<2x1024xf32, #tpu.memory_space<vmem>>, %arg2: memref<2x1024xf32, #tpu.memory_space<vmem>>) attributes {dimension_semantics = [#tpu.dimension_semantics<parallel>], iteration_bounds = array<i64: 1>, scalar_prefetch = 0 : i64, scratch_operands = 0 : i64, tpu.core_type = #tpu.core_type<tc>, window_params = [{transform_indices = @transform_0, window_bounds = array<i64: 2, 1024>}, {transform_indices = @transform_1, window_bounds = array<i64: 2, 1024>}]} {
    %c0 = arith.constant 0 : index
    %c0_0 = arith.constant 0 : index
    %0 = vector.load %arg1[%c0, %c0_0] : memref<2x1024xf32, #tpu.memory_space<vmem>>, vector<2x1024xf32>
    %c0_1 = arith.constant 0 : index
    %c0_2 = arith.constant 0 : index
    %1 = vector.load %arg2[%c0_1, %c0_2] : memref<2x1024xf32, #tpu.memory_space<vmem>>, vector<2x1024xf32>
    tpu.vector_store %arg2[%c0_1, %c0_2], %0 {strides = array<i32>} : memref<2x1024xf32, #tpu.memory_space<vmem>>, vector<2x1024xf32>,
    return
  }
  func.func @transform_0(%arg0: i32) -> (i32, i32) {
    %c0_i32 = arith.constant 0 : i32
    %c0_i32_0 = arith.constant 0 : i32
    return %arg0, %c0_i32 : i32, i32
  }
  func.func @transform_1(%arg0: i32) -> (i32, i32) {
    %c0_i32 = arith.constant 0 : i32
    %c0_i32_0 = arith.constant 0 : i32
    return %arg0, %c0_i32 : i32, i32
  }
}

</mosaic_0001>

<bundles_post_ra>
// kernel: identity.1
= control target key start
LH: loop header
LB: loop body
LE: loop exit
PB: predicated region body
PF: predicated region fallthrough
CT: control target
= control target key end

     0   :  { %s38_s0 = inlined_call_operand.vmem [shape: f32[2,1024], index: 0, kind: input, shape index: {}, may-alias: {0,1}]   ;;  %s39_s1 = inlined_call_operand.vmem [shape: f32[2,1024], index: 1, kind: output, shape index: {}, may-alias: {0,1}]  }
   0x1   :  { %v8_v0 = vld [vmem:[%s38_s0] sm:$0xff]  ;;  %v9_v1 = vld [vmem:[%s38_s0 + $0x8] sm:$0xff] }
   0x2   :  { %10 = vst [vmem:[%s39_s1] sm:$0xff] %v8_v0  ;;  %11 = vst [vmem:[%s39_s1 + $0x8] sm:$0xff] %v9_v1 }

</bundles_post_ra>
